<compile_context>
chip_gen: v5e
topology: v5e:2x2
jax: 0.10.0
libtpu: 0.0.40
codegen_flags: <defaults>
</compile_context>

<pallas_src>
import functools

import jax
import jax.numpy as jnp
from jax.experimental import pallas as pl
from jax.experimental.pallas import tpu as pltpu


def _round_up(x, m):
    return ((x + m - 1) // m) * m


def _one_hot_rows(ids, n):
    """ids: (TM, 1) int32 -> (TM, N) f32 exact row-selector matrix."""
    tm = ids.shape[0]
    col = jax.lax.broadcasted_iota(jnp.int32, (tm, n), 1)
    return (col == ids).astype(jnp.float32)


def _ge_train_kernel(ids_ref, tmu_ref, tls_ref, eps_ref, sample_ref):
    """Training: sample = mu + eps * exp(0.5*logstd2). Only the sample is stored."""
    one_hot = _one_hot_rows(ids_ref[...], tmu_ref.shape[0])        # (TM, N)
    mu = jnp.dot(one_hot, tmu_ref[...],
                 preferred_element_type=jnp.float32)               # (TM, D)
    logstd2 = jnp.dot(one_hot, tls_ref[...],
                      preferred_element_type=jnp.float32)          # (TM, D)
    sample_ref[...] = mu + eps_ref[...] * jnp.exp(0.5 * logstd2)


def _ge_eval_kernel(ids_ref, tmu_ref, mu_ref):
    """Eval: only the mu half of the table is read and only mu is stored."""
    one_hot = _one_hot_rows(ids_ref[...], tmu_ref.shape[0])
    mu_ref[...] = jnp.dot(one_hot, tmu_ref[...],
                          preferred_element_type=jnp.float32)


def _ge_params_kernel(ids_ref, table_ref, emb_ref):
    """return_params: one lane-dense (TM, 2D) slab [mu || logstd2], no split."""
    one_hot = _one_hot_rows(ids_ref[...], table_ref.shape[0])
    emb_ref[...] = jnp.dot(one_hot, table_ref[...],
                           preferred_element_type=jnp.float32)


@functools.partial(jax.jit, static_argnames=("embedding_dim", "training",
                                             "return_params", "tile_m"))
def gaussian_embedding_forward(indices, table, eps=None, *, embedding_dim,
                               training=True, return_params=False,
                               tile_m=256):
    """Pallas forward for GaussianEmbedding.

    indices: int array of arbitrary shape, values in [0, num_embeddings)
    table:   (num_embeddings, 2*embedding_dim) f32 embedding weight
    eps:     f32 array of shape indices.shape + (embedding_dim,); required only
             when training and not return_params.
    """
    d = embedding_dim
    n = table.shape[0]
    idx_shape = indices.shape
    m = 1
    for s in idx_shape:
        m *= s

    # Big-but-fitting tiles; cap to the (8-aligned) problem size for small M.
    tile = min(tile_m, _round_up(max(m, 1), 8))
    m_pad = _round_up(m, tile)

    ids_flat = indices.reshape(m, 1).astype(jnp.int32)
    if m_pad != m:
        # Padded tail rows gather row 0 and are sliced away below.
        ids_flat = jnp.pad(ids_flat, ((0, m_pad - m), (0, 0)))

    grid = (m_pad // tile,)
    ids_spec = pl.BlockSpec((tile, 1), lambda i: (i, 0))
    compiler_params = pltpu.CompilerParams(
        dimension_semantics=("parallel",))
    table_f32 = table.astype(jnp.float32)
    out_shape_full = idx_shape + (d,)

    if return_params:
        emb = pl.pallas_call(
            _ge_params_kernel,
            out_shape=jax.ShapeDtypeStruct((m_pad, 2 * d), jnp.float32),
            grid_spec=pltpu.PrefetchScalarGridSpec(
                num_scalar_prefetch=0,
                grid=grid,
                in_specs=[
                    ids_spec,
                    pl.BlockSpec((n, 2 * d), lambda i: (0, 0)),  # full table
                ],
                out_specs=pl.BlockSpec((tile, 2 * d), lambda i: (i, 0)),
            ),
            compiler_params=compiler_params,
        )(ids_flat, table_f32)
        emb = emb[:m]
        mu = emb[:, :d].reshape(out_shape_full)
        logstd2 = emb[:, d:].reshape(out_shape_full)
        return mu, logstd2

    if not training:
        mu = pl.pallas_call(
            _ge_eval_kernel,
            out_shape=jax.ShapeDtypeStruct((m_pad, d), jnp.float32),
            grid_spec=pltpu.PrefetchScalarGridSpec(
                num_scalar_prefetch=0,
                grid=grid,
                in_specs=[
                    ids_spec,
                    pl.BlockSpec((n, d), lambda i: (0, 0)),      # mu half only
                ],
                out_specs=pl.BlockSpec((tile, d), lambda i: (i, 0)),
            ),
            compiler_params=compiler_params,
        )(ids_flat, table_f32[:, :d])
        return mu[:m].reshape(out_shape_full)

    # Training path: reparameterized sample only.
    eps_flat = eps.reshape(m, d).astype(jnp.float32)
    if m_pad != m:
        # TODO(synk): for very large M avoid this full extra HBM pass over eps
        # (mask the tail in-kernel instead of padding in the wrapper).
        eps_flat = jnp.pad(eps_flat, ((0, m_pad - m), (0, 0)))

    sample = pl.pallas_call(
        _ge_train_kernel,
        out_shape=jax.ShapeDtypeStruct((m_pad, d), jnp.float32),
        grid_spec=pltpu.PrefetchScalarGridSpec(
            num_scalar_prefetch=0,
            grid=grid,
            in_specs=[
                ids_spec,
                pl.BlockSpec((n, d), lambda i: (0, 0)),          # mu half
                pl.BlockSpec((n, d), lambda i: (0, 0)),          # logstd2 half
                pl.BlockSpec((tile, d), lambda i: (i, 0)),       # eps tile
            ],
            out_specs=pl.BlockSpec((tile, d), lambda i: (i, 0)),
        ),
        compiler_params=compiler_params,
    )(ids_flat, table_f32[:, :d], table_f32[:, d:], eps_flat)
    return sample[:m].reshape(out_shape_full)


def kld(mu, logstd2):
    """GaussianInterface.kld (plain JAX glue, elementwise + mean over last axis)."""
    return -0.5 * jnp.mean(1.0 + logstd2 - mu ** 2 - jnp.exp(logstd2), axis=-1)


if __name__ == "__main__":
    key = jax.random.PRNGKey(0)
    k_tab, k_idx, k_eps = jax.random.split(key, 3)

    num_embeddings = 16
    embedding_dim = 64
    batch, seq = 2, 32   # indices shape (2, 32)

    # nn.Embedding default init ~ N(0, 1), deterministic here.
    table = jax.random.normal(k_tab, (num_embeddings, 2 * embedding_dim),
                              dtype=jnp.float32)
    indices = jax.random.randint(k_idx, (batch, seq), 0, num_embeddings,
                                 dtype=jnp.int32)
    eps = jax.random.normal(k_eps, (batch, seq, embedding_dim),
                            dtype=jnp.float32)

    # Pallas kernels: training sample, (mu, logstd2), eval mu.
    sample = gaussian_embedding_forward(indices, table, eps,
                                        embedding_dim=embedding_dim,
                                        training=True)
    mu, logstd2 = gaussian_embedding_forward(indices, table,
                                             embedding_dim=embedding_dim,
                                             return_params=True)
    mu_eval = gaussian_embedding_forward(indices, table,
                                         embedding_dim=embedding_dim,
                                         training=False)
    jax.block_until_ready((sample, mu, logstd2, mu_eval))

    # Pure-JAX reference check.
    emb_ref = table[indices]
    mu_ref = emb_ref[..., :embedding_dim]
    logstd2_ref = emb_ref[..., embedding_dim:]
    sample_ref = mu_ref + eps * jnp.exp(0.5 * logstd2_ref)

    assert sample.shape == (batch, seq, embedding_dim)
    assert jnp.allclose(mu, mu_ref, atol=1e-5, rtol=1e-5)
    assert jnp.allclose(logstd2, logstd2_ref, atol=1e-5, rtol=1e-5)
    assert jnp.allclose(mu_eval, mu_ref, atol=1e-5, rtol=1e-5)
    assert jnp.allclose(sample, sample_ref, atol=1e-4, rtol=1e-4)

    # KLD helper sanity (glue, not kernel).
    _ = jax.block_until_ready(kld(mu, logstd2))

    print("KERNEL_OK")
</pallas_src>

<mosaic_0001>
module attributes {stable_mosaic.version = 11 : i64} {
  func.func @_ge_train_kernel(%arg0: i32, %arg1: memref<64x1xi32, #tpu.memory_space<vmem>>, %arg2: memref<16x64xf32, #tpu.memory_space<vmem>>, %arg3: memref<16x64xf32, #tpu.memory_space<vmem>>, %arg4: memref<64x64xf32, #tpu.memory_space<vmem>>, %arg5: memref<64x64xf32, #tpu.memory_space<vmem>>) attributes {dimension_semantics = [#tpu.dimension_semantics<parallel>], iteration_bounds = array<i64: 1>, scalar_prefetch = 0 : i64, scratch_operands = 0 : i64, tpu.core_type = #tpu.core_type<tc>, window_params = [{transform_indices = @transform_0, window_bounds = array<i64: 64, 1>}, {pipeline_mode = #tpu.pipeline_mode<synchronous>, transform_indices = @transform_1, window_bounds = array<i64: 16, 64>}, {pipeline_mode = #tpu.pipeline_mode<synchronous>, transform_indices = @transform_2, window_bounds = array<i64: 16, 64>}, {transform_indices = @transform_3, window_bounds = array<i64: 64, 64>}, {transform_indices = @transform_4, window_bounds = array<i64: 64, 64>}]} {
    %c0 = arith.constant 0 : index
    %c0_0 = arith.constant 0 : index
    %0 = vector.load %arg1[%c0, %c0_0] : memref<64x1xi32, #tpu.memory_space<vmem>>, vector<64x1xi32>
    %1 = tpu.iota {dimensions = array<i32: 1>} : vector<64x16xi32>
    %2 = vector.broadcast %0 : vector<64x1xi32> to vector<64x16xi32>
    %3 = arith.cmpi eq, %1, %2 : vector<64x16xi32>
    %4 = arith.extui %3 : vector<64x16xi1> to vector<64x16xi32>
    %5 = arith.sitofp %4 : vector<64x16xi32> to vector<64x16xf32>
    %c0_1 = arith.constant 0 : index
    %c0_2 = arith.constant 0 : index
    %6 = vector.load %arg2[%c0_1, %c0_2] : memref<16x64xf32, #tpu.memory_space<vmem>>, vector<16x64xf32>
    %cst = arith.constant dense<0.000000e+00> : vector<64x64xf32>
    %7 = tpu.matmul %5, %6, %cst {dimension_numbers = #tpu.dot_dimension_numbers<[1], [0], [0], [1], [0, 0, 1, 1], [], []>} : vector<64x16xf32>, vector<16x64xf32>, vector<64x64xf32> -> vector<64x64xf32>
    %c0_3 = arith.constant 0 : index
    %c0_4 = arith.constant 0 : index
    %8 = vector.load %arg3[%c0_3, %c0_4] : memref<16x64xf32, #tpu.memory_space<vmem>>, vector<16x64xf32>
    %cst_5 = arith.constant dense<0.000000e+00> : vector<64x64xf32>
    %9 = tpu.matmul %5, %8, %cst_5 {dimension_numbers = #tpu.dot_dimension_numbers<[1], [0], [0], [1], [0, 0, 1, 1], [], []>} : vector<64x16xf32>, vector<16x64xf32>, vector<64x64xf32> -> vector<64x64xf32>
    %c0_6 = arith.constant 0 : index
    %c0_7 = arith.constant 0 : index
    %10 = vector.load %arg4[%c0_6, %c0_7] : memref<64x64xf32, #tpu.memory_space<vmem>>, vector<64x64xf32>
    %cst_8 = arith.constant 5.000000e-01 : f32
    %11 = vector.broadcast %cst_8 : f32 to vector<64x64xf32>
    %12 = arith.mulf %11, %9 : vector<64x64xf32>
    %13 = math.exp %12 : vector<64x64xf32>
    %14 = arith.mulf %10, %13 : vector<64x64xf32>
    %15 = arith.addf %7, %14 : vector<64x64xf32>
    %c0_9 = arith.constant 0 : index
    %c0_10 = arith.constant 0 : index
    %16 = vector.load %arg5[%c0_9, %c0_10] : memref<64x64xf32, #tpu.memory_space<vmem>>, vector<64x64xf32>
    tpu.vector_store %arg5[%c0_9, %c0_10], %15 {strides = array<i32>} : memref<64x64xf32, #tpu.memory_space<vmem>>, vector<64x64xf32>,
    return
  }
  func.func @transform_0(%arg0: i32) -> (i32, i32) {
    %c0_i32 = arith.constant 0 : i32
    %c0_i32_0 = arith.constant 0 : i32
    return %arg0, %c0_i32 : i32, i32
  }
  func.func @transform_1(%arg0: i32) -> (i32, i32) {
    %c0_i32 = arith.constant 0 : i32
    %c0_i32_0 = arith.constant 0 : i32
    %c0_i32_1 = arith.constant 0 : i32
    return %c0_i32, %c0_i32_0 : i32, i32
  }
  func.func @transform_2(%arg0: i32) -> (i32, i32) {
    %c0_i32 = arith.constant 0 : i32
    %c0_i32_0 = arith.constant 0 : i32
    %c0_i32_1 = arith.constant 0 : i32
    return %c0_i32, %c0_i32_0 : i32, i32
  }
  func.func @transform_3(%arg0: i32) -> (i32, i32) {
    %c0_i32 = arith.constant 0 : i32
    %c0_i32_0 = arith.constant 0 : i32
    return %arg0, %c0_i32 : i32, i32
  }
  func.func @transform_4(%arg0: i32) -> (i32, i32) {
    %c0_i32 = arith.constant 0 : i32
    %c0_i32_0 = arith.constant 0 : i32
    return %arg0, %c0_i32 : i32, i32
  }
}

</mosaic_0001>

<bundles_post_ra>
// kernel: gaussian_embedding_forward.1
= control target key start
LH: loop header
LB: loop body
LE: loop exit
PB: predicated region body
PF: predicated region fallthrough
CT: control target
= control target key end

     0   :  { %v332_v2 = vmov 0   ;;  %s449_s0 = inlined_call_operand.vmem [shape: s32[64,1], index: 0, kind: input, shape index: {}]   ;;  %s450_s1 = inlined_call_operand.vmem [shape: f32[16,64], index: 1, kind: input, shape index: {}]   ;;  %s451_s2 = inlined_call_operand.vmem [shape: f32[16,64], index: 2, kind: input, shape index: {}]   ;;  %s452_s3 = inlined_call_operand.vmem [shape: f32[64,64], index: 3, kind: input, shape index: {}]   ;;  %s453_s4 = inlined_call_operand.hbm [shape: f32[64,64], index: 4, kind: output, shape index: {}]  }
   0x1   :  { %v23_v0 = vld [vmem:[%s449_s0 + $0x28] sm:$0xff]  ;;  %v22_v1 = vld [vmem:[%s449_s0 + $0x20] sm:$0xff]  ;;  %288 = vset.pattern.permute.xlu1 %v332_v2  ;;  %287 = vset.pattern.permute.xlu0 %v332_v2  ;;  %v24_v3 = vld [vmem:[%s449_s0 + $0x30] sm:$0xff] }
   0x2   :  { %44 = vperm.xlu1 %288, %v23_v0   ;;  %41 = vperm.xlu0 %287, %v22_v1   ;;  %v79_v4 = vld [vmem:[%s451_s2 + $0x8] sm:$0xff] }
   0x3   :  { %289 = vset.pattern.permute.xlu2 %v332_v2  ;;  %278 = vmatpush.msra.mxu2 %v79_v4  ;;  %v77_v5 = vld [vmem:[%s450_s1 + $0x8] sm:$0xff] }
   0x4   :  { %9 = vsyncpa [#allocation3], 0  ;;  %47 = vperm.xlu2 %289, %v24_v3   ;;  %280 = vmatpush.msra.mxu3 %v77_v5  ;;  %v19_v6 = vld [vmem:[%s449_s0 + $0x8] sm:$0xff]  ;;  %v18_v7 = vld [vmem:[%s449_s0] sm:$0xff]  ;;  %v26_v13 = vlaneseq  ;;  %vm80_vm0 = vcmask 130048   ;;  %v333_v17 = vmov 0.0  }
   0x5   :  { %119 = vmatpush.msra.mxu0 %v79_v4  ;;  %200 = vmatpush.msra.mxu1 %v77_v5  ;;  %v20_v8 = vld [vmem:[%s449_s0 + $0x10] sm:$0xff]  ;;  %v21_v9 = vld [vmem:[%s449_s0 + $0x18] sm:$0xff]  ;;  %v78_v11 = vld [vmem:[%s451_s2] sm:$0xff]  ;;  %vm227_vm9 = vcmask 523264   ;;  %s334_s26 = smov [#allocation2]   ;;  %s242_s30 = sshll.u32 %s453_s4, 4  ;;  %s243_s30 = int_to_ptr.hbm [resolvable:$true] %s242_s30 }
   0x6   :  { %v25_v10 = vld [vmem:[%s449_s0 + $0x38] sm:$0xff]  ;;  %v76_v12 = vld [vmem:[%s450_s1] sm:$0xff]  ;;  %279 = vmatpush.msra.mxu2 %v78_v11  ;;  %v27_v14 = vand.u32 127, %v26_v13  ;;  %v151_v55 = vld [vmem:[%s452_s3 + $0x28] sm:$0xff]  ;;  %s240_s27 = sshll.u32 %s334_s26, 4  ;;  %s336_s5 = smov 8   ;;  %s241_s27 = int_to_ptr.vmem [resolvable:$true] %s240_s27 }
   0x7   :  { %281 = vmatpush.msra.mxu3 %v76_v12  ;;  %120 = vmatpush.msra.mxu0 %v78_v11  ;;  %v150_v40 = vld [vmem:[%s452_s3 + $0x20] sm:$0xff]  ;;  %v147_v60 = vld [vmem:[%s452_s3 + $0x8] sm:$0xff] }
   0x8   :  { %201 = vmatpush.msra.mxu1 %v76_v12  ;;  %v146_v45 = vld [vmem:[%s452_s3] sm:$0xff]  ;;  %v148_v12 = vld [vmem:[%s452_s3 + $0x10] sm:$0xff] }
   0xa   :  { %32 = vperm.xlu1 %288, %v19_v6   ;;  %29 = vperm.xlu0 %287, %v18_v7   ;;  %v152_v7 = vld [vmem:[%s452_s3 + $0x30] sm:$0xff] }
   0xc   :  { %35 = vperm.xlu2 %289, %v20_v8  }
  0x12   :  { %38 = vperm.xlu1 %288, %v21_v9   ;;  %50 = vperm.xlu0 %287, %v25_v10  }
  0x5e   :  { %v48_v21 = vpop.permute.xlu2 %47 }
  0x5f   :  { %vm58_vm4 = vcmp.eq.s32.totalorder %v27_v14, %v48_v21 }
  0x60   :  { %v260_v24 = vsel %vm58_vm4, 1.0, %v333_v17 }
  0x66   :  { %v36_v26 = vpop.permute.xlu2 %35 }
  0x67   :  { %vm54_vm6 = vcmp.eq.s32.totalorder %v27_v14, %v36_v26 }
  0x68   :  { %v256_v28 = vsel %vm54_vm6, 1.0, %v333_v17 }
  0x74   :  { %v42_v15 = vpop.permute.xlu0 %41  ;;  %v45_v16 = vpop.permute.xlu1 %44 }
  0x75   :  { %vm56_vm1 = vcmp.eq.s32.totalorder %v27_v14, %v42_v15  ;;  %vm57_vm2 = vcmp.eq.s32.totalorder %v27_v14, %v45_v16 }
  0x76   :  { %v258_v18 = vsel %vm56_vm1, 1.0, %v333_v17  ;;  %v259_v19 = vsel %vm57_vm2, 1.0, %v333_v17 }
  0x77   :  { %266 = vmatmul.msk.f32.vlgmr.msra.gmra.mxu2 %vm80_vm0, %v258_v18  ;;  %274 = vmatmul.msk.f32.vlgmr.msra.gmra.mxu3 %vm80_vm0, %v258_v18 }
  0x7c   :  { %v30_v20 = vpop.permute.xlu0 %29  ;;  %v33_v23 = vpop.permute.xlu1 %32 }
  0x7d   :  { %vm52_vm3 = vcmp.eq.s32.totalorder %v27_v14, %v30_v20  ;;  %vm53_vm5 = vcmp.eq.s32.totalorder %v27_v14, %v33_v23 }
  0x7e   :  { %v254_v22 = vsel %vm52_vm3, 1.0, %v333_v17  ;;  %v255_v25 = vsel %vm53_vm5, 1.0, %v333_v17 }
  0x7f   :  { %262 = vmatmul.msk.f32.vlgmr.msra.gmra.mxu0 %vm80_vm0, %v254_v22  ;;  %267 = vmatmul.msk.f32.gmra.mxu2 %vm80_vm0, %v259_v19 }
  0x80   :  { %270 = vmatmul.msk.f32.vlgmr.msra.gmra.mxu1 %vm80_vm0, %v254_v22  ;;  %275 = vmatmul.msk.f32.gmra.mxu3 %vm80_vm0, %v259_v19  ;;  %v153_v22 = vld [vmem:[%s452_s3 + $0x38] sm:$0xff] }
  0x84   :  { %v51_v27 = vpop.permute.xlu0 %50  ;;  %v39_v30 = vpop.permute.xlu1 %38 }
  0x85   :  { %vm59_vm7 = vcmp.eq.s32.totalorder %v27_v14, %v51_v27  ;;  %vm55_vm8 = vcmp.eq.s32.totalorder %v27_v14, %v39_v30 }
  0x86   :  { %v261_v29 = vsel %vm59_vm7, 1.0, %v333_v17  ;;  %v257_v31 = vsel %vm55_vm8, 1.0, %v333_v17 }
  0x87   :  { %263 = vmatmul.msk.f32.gmra.mxu0 %vm80_vm0, %v255_v25  ;;  %268 = vmatmul.msk.f32.gmra.mxu2 %vm80_vm0, %v260_v24 }
  0x88   :  { %271 = vmatmul.msk.f32.gmra.mxu1 %vm80_vm0, %v255_v25  ;;  %276 = vmatmul.msk.f32.gmra.mxu3 %vm80_vm0, %v260_v24  ;;  %v149_v24 = vld [vmem:[%s452_s3 + $0x18] sm:$0xff]  ;;  %s335_s3 = smov 128  }
  0x8f   :  { %264 = vmatmul.msk.f32.gmra.mxu0 %vm80_vm0, %v256_v28  ;;  %269 = vmatmul.msk.f32.gmra.mxu2 %vm80_vm0, %v261_v29 }
  0x90   :  { %272 = vmatmul.msk.f32.gmra.mxu1 %vm80_vm0, %v256_v28  ;;  %277 = vmatmul.msk.f32.gmra.mxu3 %vm80_vm0, %v261_v29 }
  0x97   :  { %265 = vmatmul.msk.f32.gmra.mxu0 %vm80_vm0, %v257_v31 }
  0x98   :  { %273 = vmatmul.msk.f32.gmra.mxu1 %vm80_vm0, %v257_v31 }
  0xfa   :  { %v134_v32 = vpop.f32.mrf.mxu2  ;;  %v215_v38 = vpop.f32.mrf.mxu3 }
  0xfb   :  { %v158_v33 = vmul.f32 0.5, %v134_v32 }
  0xfc   :  { %v122_v34 = vpop.f32.mrf.mxu0 }
  0xfd   :  { %v170_v35 = vmul.f32 1.442695, %v158_v33  ;;  %v154_v36 = vmul.f32 0.5, %v122_v34  ;;  %v203_v41 = vpop.f32.mrf.mxu1 }
  0xff   :  { %290 = vpow2.f32 %v170_v35  ;;  %v162_v37 = vmul.f32 1.442695, %v154_v36 }
 0x101   :  { %292 = vpow2.f32 %v162_v37 }
 0x102   :  { %v137_v39 = vpop.f32.mrf.mxu2 }
 0x103   :  { %v159_v42 = vmul.f32 0.5, %v137_v39  ;;  %v218_v56 = vpop.f32.mrf.mxu3 }
 0x104   :  { %v125_v43 = vpop.f32.mrf.mxu0 }
 0x105   :  { %v291_v44 = vpop.eup %290  ;;  %v172_v46 = vmul.f32 1.442695, %v159_v42  ;;  %v155_v47 = vmul.f32 0.5, %v125_v43  ;;  %v206_v61 = vpop.f32.mrf.mxu1 }
 0x106   :  { %v182_v48 = vmul.f32 %v291_v44, %v150_v40 }
 0x107   :  { %v293_v49 = vpop.eup %292  ;;  %294 = vpow2.f32 %v172_v46  ;;  %v164_v50 = vmul.f32 1.442695, %v155_v47 }
 0x108   :  { %v216_v51 = vadd.f32 %v215_v38, %v182_v48  ;;  %v178_v52 = vmul.f32 %v293_v49, %v146_v45 }
 0x109   :  { %296 = vpow2.f32 %v164_v50 }
 0x10a   :  { %232 = vst.msk [vmem:[#allocation2 + $0x20] sm:$0xff] %vm227_vm9, %v216_v51  ;;  %v204_v53 = vadd.f32 %v203_v41, %v178_v52  ;;  %v140_v54 = vpop.f32.mrf.mxu2 }
 0x10b   :  { %v160_v57 = vmul.f32 0.5, %v140_v54  ;;  %v221_v11 = vpop.f32.mrf.mxu3 }
 0x10c   :  { %228 = vst.msk [vmem:[#allocation2] sm:$0xff] %vm227_vm9, %v204_v53  ;;  %v128_v58 = vpop.f32.mrf.mxu0 }
 0x10d   :  { %v295_v59 = vpop.eup %294  ;;  %v174_v62 = vmul.f32 1.442695, %v160_v57  ;;  %v156_v63 = vmul.f32 0.5, %v128_v58  ;;  %v209_v17 = vpop.f32.mrf.mxu1 }
 0x10e   :  { %v183_v0 = vmul.f32 %v295_v59, %v151_v55 }
 0x10f   :  { %v297_v1 = vpop.eup %296  ;;  %298 = vpow2.f32 %v174_v62  ;;  %v166_v2 = vmul.f32 1.442695, %v156_v63 }
 0x110   :  { %v219_v3 = vadd.f32 %v218_v56, %v183_v0  ;;  %v179_v4 = vmul.f32 %v297_v1, %v147_v60 }
 0x111   :  { %300 = vpow2.f32 %v166_v2 }
 0x112   :  { %233 = vst.msk [vmem:[#allocation2 + $0x28] sm:$0xff] %vm227_vm9, %v219_v3  ;;  %v207_v5 = vadd.f32 %v206_v61, %v179_v4  ;;  %v143_v6 = vpop.f32.mrf.mxu2 }
 0x113   :  { %v161_v8 = vmul.f32 0.5, %v143_v6  ;;  %v224_v27 = vpop.f32.mrf.mxu3 }
 0x114   :  { %229 = vst.msk [vmem:[#allocation2 + $0x8] sm:$0xff] %vm227_vm9, %v207_v5  ;;  %v131_v9 = vpop.f32.mrf.mxu0 }
 0x115   :  { %v299_v10 = vpop.eup %298  ;;  %v176_v13 = vmul.f32 1.442695, %v161_v8  ;;  %v157_v14 = vmul.f32 0.5, %v131_v9  ;;  %v212_v30 = vpop.f32.mrf.mxu1 }
 0x116   :  { %v184_v15 = vmul.f32 %v299_v10, %v152_v7 }
 0x117   :  { %v301_v16 = vpop.eup %300  ;;  %302 = vpow2.f32 %v176_v13  ;;  %v168_v18 = vmul.f32 1.442695, %v157_v14 }
 0x118   :  { %v222_v19 = vadd.f32 %v221_v11, %v184_v15  ;;  %v180_v20 = vmul.f32 %v301_v16, %v148_v12 }
 0x119   :  { %304 = vpow2.f32 %v168_v18 }
 0x11a   :  { %234 = vst.msk [vmem:[#allocation2 + $0x30] sm:$0xff] %vm227_vm9, %v222_v19  ;;  %v210_v21 = vadd.f32 %v209_v17, %v180_v20 }
 0x11c   :  { %230 = vst.msk [vmem:[#allocation2 + $0x10] sm:$0xff] %vm227_vm9, %v210_v21 }
 0x11d   :  { %v303_v23 = vpop.eup %302 }
 0x11e   :  { %v185_v25 = vmul.f32 %v303_v23, %v153_v22 }
 0x11f   :  { %v305_v26 = vpop.eup %304 }
 0x120   :  { %v225_v28 = vadd.f32 %v224_v27, %v185_v25  ;;  %v181_v29 = vmul.f32 %v305_v26, %v149_v24 }
 0x122   :  { %235 = vst.msk [vmem:[#allocation2 + $0x38] sm:$0xff] %vm227_vm9, %v225_v28  ;;  %v213_v31 = vadd.f32 %v212_v30, %v181_v29 }
 0x124   :  { %231 = vst.msk [vmem:[#allocation2 + $0x18] sm:$0xff] %vm227_vm9, %v213_v31 }
 0x125   :  { %248 = dma.vmem_to_hbm [thread:$0]  %s241_s27, 1024, %s243_s30, [#allocation3], %s335_s3, %s335_s3, %s336_s5  }
 0x126   :  { %330 = dma.done.wait [#allocation3], 1024  }
 0x127   :  { %331 = vsyncadd [#allocation3], 4294966272 }
 0x128   :  { %253 = vsyncpa [#allocation3], 1 }

</bundles_post_ra>
